<compile_context>
chip_gen: v6e
topology: v6e:2x2x1
jax: 0.10.0
libtpu: 0.0.40
codegen_flags: <defaults>
</compile_context>

<pallas_src>
import jax
import jax.numpy as jnp
import numpy as np
from jax.experimental import pallas as pl
from jax.experimental.pallas import tpu as pltpu


# ----------------------------- Pallas kernel ------------------------------- #

def _conv3x3_im2col(x, w2d, masks, W):
    """3x3 'same' convolution in a channels-on-sublanes (C, H*W) layout.

    x:     (Cin,  HW)    f32 -- flattened spatial on lanes
    w2d:   (Cout, 9*Cin) f32 -- tap-major, BN scale already folded in
    masks: (9, HW)       f32 -- per-tap boundary validity masks
    Returns (Cout, HW) f32.
    """
    Cin, HW = x.shape
    cols = []
    for t in range(9):                              # static unroll, 9 taps
        dy, dx = t // 3 - 1, t % 3 - 1
        s = dy * W + dx                             # flattened tap shift
        shifted = pltpu.roll(x, shift=(-s) % HW, axis=1)   # XLU lane roll
        cols.append(shifted * masks[t:t + 1, :])           # zero out-of-image
    col = jnp.concatenate(cols, axis=0)             # (9*Cin, HW) im2col
    return jnp.dot(w2d, col, preferred_element_type=jnp.float32)


def _make_block_kernel(W):
    def kernel(x_ref, masks_ref, w1_ref, b1_ref, w2_ref, b2_ref, o_ref):
        x = x_ref[0].astype(jnp.float32)            # (C, HW)
        masks = masks_ref[...]                      # (9, HW)

        # conv1 -> bn1 (scale folded into w1) -> relu     (h stays on-chip)
        h = _conv3x3_im2col(x, w1_ref[...], masks, W)
        h = jnp.maximum(h + b1_ref[...], 0.0)

        # conv2 -> bn2 -> += residual -> relu
        out = _conv3x3_im2col(h, w2_ref[...], masks, W)
        out = jnp.maximum(out + b2_ref[...] + x, 0.0)

        o_ref[0] = out.astype(o_ref.dtype)
    return kernel


# ------------------------------ wrapper glue -------------------------------- #

def _fold_bn_into_conv(w, gamma, beta, mean, var, eps=1e-5):
    """Torch (Cout,Cin,3,3) weight + BN stats -> (Cout, 9*Cin) weight, (Cout,1) bias."""
    scale = gamma / jnp.sqrt(var + eps)
    bias = beta - mean * scale
    cout, cin = w.shape[0], w.shape[1]
    # (Cout, Cin, 3, 3) -> (Cout, ky, kx, Cin) -> (Cout, 9*Cin), tap-major.
    w2d = jnp.transpose(w, (0, 2, 3, 1)).reshape(cout, 9 * cin)
    return ((w2d * scale[:, None]).astype(jnp.float32),
            bias.reshape(cout, 1).astype(jnp.float32))


def _tap_masks(H, W):
    yy, xx = np.meshgrid(np.arange(H), np.arange(W), indexing="ij")
    masks = np.zeros((9, H * W), np.float32)
    for t in range(9):
        dy, dx = t // 3 - 1, t % 3 - 1
        valid = ((yy + dy >= 0) & (yy + dy < H) &
                 (xx + dx >= 0) & (xx + dx < W))
        masks[t] = valid.reshape(-1).astype(np.float32)
    return jnp.asarray(masks)


def basic_block_forward(x_nchw, params):
    """Equivalent of BasicBlock.forward (stride=1, downsample=None)."""
    N, C, H, W = x_nchw.shape
    HW = H * W
    x = x_nchw.reshape(N, C, HW).astype(jnp.float32)   # free reshape (NCHW kept)

    w1, b1 = _fold_bn_into_conv(params["conv1_w"], params["bn1_gamma"],
                                params["bn1_beta"], params["bn1_mean"],
                                params["bn1_var"])
    w2, b2 = _fold_bn_into_conv(params["conv2_w"], params["bn2_gamma"],
                                params["bn2_beta"], params["bn2_mean"],
                                params["bn2_var"])
    masks = _tap_masks(H, W)

    flops = 4 * N * HW * 9 * C * C                     # 2 convs * 2 * MACs
    bytes_accessed = (2 * N * C * HW + 2 * C * 9 * C + 2 * C + 9 * HW) * 4

    out = pl.pallas_call(
        _make_block_kernel(W),
        out_shape=jax.ShapeDtypeStruct((N, C, HW), jnp.float32),
        grid=(N,),
        in_specs=[
            pl.BlockSpec((1, C, HW), lambda n: (n, 0, 0)),   # x, one image/step
            pl.BlockSpec((9, HW), lambda n: (0, 0)),         # tap masks
            pl.BlockSpec((C, 9 * C), lambda n: (0, 0)),      # w1 (BN folded)
            pl.BlockSpec((C, 1), lambda n: (0, 0)),          # b1
            pl.BlockSpec((C, 9 * C), lambda n: (0, 0)),      # w2 (BN folded)
            pl.BlockSpec((C, 1), lambda n: (0, 0)),          # b2
        ],
        out_specs=pl.BlockSpec((1, C, HW), lambda n: (n, 0, 0)),
        compiler_params=pltpu.CompilerParams(
            dimension_semantics=("parallel",)),
        cost_estimate=pl.CostEstimate(flops=flops, transcendentals=0,
                                      bytes_accessed=bytes_accessed),
    )(x, masks, w1, b1, w2, b2)

    return out.reshape(N, C, H, W)


# ---------------------------- pure-JAX reference ---------------------------- #

def _reference(x, params):
    def conv(inp, w):
        return jax.lax.conv_general_dilated(
            inp.astype(jnp.float32), w.astype(jnp.float32), (1, 1), "SAME",
            dimension_numbers=("NCHW", "OIHW", "NCHW"))

    def bn(y, g, b, m, v, eps=1e-5):
        s = g / jnp.sqrt(v + eps)
        return y * s[None, :, None, None] + (b - m * s)[None, :, None, None]

    h = jnp.maximum(bn(conv(x, params["conv1_w"]), params["bn1_gamma"],
                       params["bn1_beta"], params["bn1_mean"],
                       params["bn1_var"]), 0.0)
    o = bn(conv(h, params["conv2_w"]), params["bn2_gamma"],
           params["bn2_beta"], params["bn2_mean"], params["bn2_var"])
    return jnp.maximum(o + x.astype(jnp.float32), 0.0)


# ---------------------------------- main ------------------------------------ #

if __name__ == "__main__":
    N, C, H, W = 2, 8, 16, 16          # inplanes == planes, stride=1
    key = jax.random.PRNGKey(0)
    keys = jax.random.split(key, 12)

    x = jax.random.normal(keys[0], (N, C, H, W), jnp.float32)

    params = {
        "conv1_w":  jax.random.normal(keys[1], (C, C, 3, 3), jnp.float32) * 0.1,
        "conv2_w":  jax.random.normal(keys[2], (C, C, 3, 3), jnp.float32) * 0.1,
        "bn1_gamma": jax.random.uniform(keys[3], (C,), jnp.float32, 0.5, 1.5),
        "bn1_beta":  jax.random.normal(keys[4], (C,), jnp.float32) * 0.1,
        "bn1_mean":  jax.random.normal(keys[5], (C,), jnp.float32) * 0.1,
        "bn1_var":   jax.random.uniform(keys[6], (C,), jnp.float32, 0.5, 1.5),
        "bn2_gamma": jax.random.uniform(keys[7], (C,), jnp.float32, 0.5, 1.5),
        "bn2_beta":  jax.random.normal(keys[8], (C,), jnp.float32) * 0.1,
        "bn2_mean":  jax.random.normal(keys[9], (C,), jnp.float32) * 0.1,
        "bn2_var":   jax.random.uniform(keys[10], (C,), jnp.float32, 0.5, 1.5),
    }

    out = jax.block_until_ready(basic_block_forward(x, params))
    ref = jax.block_until_ready(_reference(x, params))

    assert out.shape == (N, C, H, W), out.shape
    np.testing.assert_allclose(np.asarray(out), np.asarray(ref),
                               rtol=1e-4, atol=1e-4)
    print("KERNEL_OK")
</pallas_src>

<mosaic_0001>
module attributes {stable_mosaic.version = 11 : i64} {
  func.func @kernel(%arg0: i32, %arg1: memref<1x8x256xf32, #tpu.memory_space<vmem>>, %arg2: memref<9x256xf32, #tpu.memory_space<vmem>>, %arg3: memref<8x72xf32, #tpu.memory_space<vmem>>, %arg4: memref<8x1xf32, #tpu.memory_space<vmem>>, %arg5: memref<8x72xf32, #tpu.memory_space<vmem>>, %arg6: memref<8x1xf32, #tpu.memory_space<vmem>>, %arg7: memref<1x8x256xf32, #tpu.memory_space<vmem>>) attributes {dimension_semantics = [#tpu.dimension_semantics<parallel>], iteration_bounds = array<i64: 2>, scalar_prefetch = 0 : i64, scratch_operands = 0 : i64, tpu.core_type = #tpu.core_type<tc>, window_params = [{transform_indices = @transform_0, window_bounds = array<i64: 1, 8, 256>}, {pipeline_mode = #tpu.pipeline_mode<synchronous>, transform_indices = @transform_1, window_bounds = array<i64: 9, 256>}, {pipeline_mode = #tpu.pipeline_mode<synchronous>, transform_indices = @transform_2, window_bounds = array<i64: 8, 72>}, {pipeline_mode = #tpu.pipeline_mode<synchronous>, transform_indices = @transform_3, window_bounds = array<i64: 8, 1>}, {pipeline_mode = #tpu.pipeline_mode<synchronous>, transform_indices = @transform_4, window_bounds = array<i64: 8, 72>}, {pipeline_mode = #tpu.pipeline_mode<synchronous>, transform_indices = @transform_5, window_bounds = array<i64: 8, 1>}, {transform_indices = @transform_6, window_bounds = array<i64: 1, 8, 256>}]} {
    %c0 = arith.constant 0 : index
    %c0_0 = arith.constant 0 : index
    %c0_1 = arith.constant 0 : index
    %0 = vector.load %arg1[%c0, %c0_0, %c0_1] : memref<1x8x256xf32, #tpu.memory_space<vmem>>, vector<1x8x256xf32>
    %1 = vector.shape_cast %0 : vector<1x8x256xf32> to vector<8x256xf32>
    %c0_2 = arith.constant 0 : index
    %c0_3 = arith.constant 0 : index
    %2 = vector.load %arg2[%c0_2, %c0_3] : memref<9x256xf32, #tpu.memory_space<vmem>>, vector<9x256xf32>
    %c0_4 = arith.constant 0 : index
    %c0_5 = arith.constant 0 : index
    %3 = vector.load %arg3[%c0_4, %c0_5] : memref<8x72xf32, #tpu.memory_space<vmem>>, vector<8x72xf32>
    %c17_i32 = arith.constant 17 : i32
    %4 = tpu.dynamic_rotate %1 by %c17_i32 dim 1 : vector<8x256xf32>, i32 -> vector<8x256xf32>
    %5 = vector.extract_strided_slice %2 {offsets = [0, 0], sizes = [1, 256], strides = [1, 1]} : vector<9x256xf32> to vector<1x256xf32>
    %6 = vector.broadcast %5 : vector<1x256xf32> to vector<8x256xf32>
    %7 = arith.mulf %4, %6 : vector<8x256xf32>
    %c16_i32 = arith.constant 16 : i32
    %8 = tpu.dynamic_rotate %1 by %c16_i32 dim 1 : vector<8x256xf32>, i32 -> vector<8x256xf32>
    %9 = vector.extract_strided_slice %2 {offsets = [1, 0], sizes = [1, 256], strides = [1, 1]} : vector<9x256xf32> to vector<1x256xf32>
    %10 = vector.broadcast %9 : vector<1x256xf32> to vector<8x256xf32>
    %11 = arith.mulf %8, %10 : vector<8x256xf32>
    %c15_i32 = arith.constant 15 : i32
    %12 = tpu.dynamic_rotate %1 by %c15_i32 dim 1 : vector<8x256xf32>, i32 -> vector<8x256xf32>
    %13 = vector.extract_strided_slice %2 {offsets = [2, 0], sizes = [1, 256], strides = [1, 1]} : vector<9x256xf32> to vector<1x256xf32>
    %14 = vector.broadcast %13 : vector<1x256xf32> to vector<8x256xf32>
    %15 = arith.mulf %12, %14 : vector<8x256xf32>
    %c1_i32 = arith.constant 1 : i32
    %16 = tpu.dynamic_rotate %1 by %c1_i32 dim 1 : vector<8x256xf32>, i32 -> vector<8x256xf32>
    %17 = vector.extract_strided_slice %2 {offsets = [3, 0], sizes = [1, 256], strides = [1, 1]} : vector<9x256xf32> to vector<1x256xf32>
    %18 = vector.broadcast %17 : vector<1x256xf32> to vector<8x256xf32>
    %19 = arith.mulf %16, %18 : vector<8x256xf32>
    %c0_i32 = arith.constant 0 : i32
    %20 = tpu.dynamic_rotate %1 by %c0_i32 dim 1 : vector<8x256xf32>, i32 -> vector<8x256xf32>
    %21 = vector.extract_strided_slice %2 {offsets = [4, 0], sizes = [1, 256], strides = [1, 1]} : vector<9x256xf32> to vector<1x256xf32>
    %22 = vector.broadcast %21 : vector<1x256xf32> to vector<8x256xf32>
    %23 = arith.mulf %20, %22 : vector<8x256xf32>
    %c255_i32 = arith.constant 255 : i32
    %24 = tpu.dynamic_rotate %1 by %c255_i32 dim 1 : vector<8x256xf32>, i32 -> vector<8x256xf32>
    %25 = vector.extract_strided_slice %2 {offsets = [5, 0], sizes = [1, 256], strides = [1, 1]} : vector<9x256xf32> to vector<1x256xf32>
    %26 = vector.broadcast %25 : vector<1x256xf32> to vector<8x256xf32>
    %27 = arith.mulf %24, %26 : vector<8x256xf32>
    %c241_i32 = arith.constant 241 : i32
    %28 = tpu.dynamic_rotate %1 by %c241_i32 dim 1 : vector<8x256xf32>, i32 -> vector<8x256xf32>
    %29 = vector.extract_strided_slice %2 {offsets = [6, 0], sizes = [1, 256], strides = [1, 1]} : vector<9x256xf32> to vector<1x256xf32>
    %30 = vector.broadcast %29 : vector<1x256xf32> to vector<8x256xf32>
    %31 = arith.mulf %28, %30 : vector<8x256xf32>
    %c240_i32 = arith.constant 240 : i32
    %32 = tpu.dynamic_rotate %1 by %c240_i32 dim 1 : vector<8x256xf32>, i32 -> vector<8x256xf32>
    %33 = vector.extract_strided_slice %2 {offsets = [7, 0], sizes = [1, 256], strides = [1, 1]} : vector<9x256xf32> to vector<1x256xf32>
    %34 = vector.broadcast %33 : vector<1x256xf32> to vector<8x256xf32>
    %35 = arith.mulf %32, %34 : vector<8x256xf32>
    %c239_i32 = arith.constant 239 : i32
    %36 = tpu.dynamic_rotate %1 by %c239_i32 dim 1 : vector<8x256xf32>, i32 -> vector<8x256xf32>
    %37 = vector.extract_strided_slice %2 {offsets = [8, 0], sizes = [1, 256], strides = [1, 1]} : vector<9x256xf32> to vector<1x256xf32>
    %38 = vector.broadcast %37 : vector<1x256xf32> to vector<8x256xf32>
    %39 = arith.mulf %36, %38 : vector<8x256xf32>
    %40 = tpu.concatenate %7, %11, %15, %19, %23, %27, %31, %35, %39 in 0 : vector<8x256xf32>, vector<8x256xf32>, vector<8x256xf32>, vector<8x256xf32>, vector<8x256xf32>, vector<8x256xf32>, vector<8x256xf32>, vector<8x256xf32>, vector<8x256xf32> -> vector<72x256xf32>
    %cst = arith.constant dense<0.000000e+00> : vector<8x256xf32>
    %41 = tpu.matmul %3, %40, %cst {dimension_numbers = #tpu.dot_dimension_numbers<[1], [0], [0], [1], [0, 0, 1, 1], [], []>} : vector<8x72xf32>, vector<72x256xf32>, vector<8x256xf32> -> vector<8x256xf32>
    %c0_6 = arith.constant 0 : index
    %c0_7 = arith.constant 0 : index
    %42 = vector.load %arg4[%c0_6, %c0_7] : memref<8x1xf32, #tpu.memory_space<vmem>>, vector<8x1xf32>
    %43 = vector.broadcast %42 : vector<8x1xf32> to vector<8x256xf32>
    %44 = arith.addf %41, %43 : vector<8x256xf32>
    %cst_8 = arith.constant 0.000000e+00 : f32
    %45 = vector.broadcast %cst_8 : f32 to vector<8x256xf32>
    %46 = arith.maximumf %44, %45 : vector<8x256xf32>
    %c0_9 = arith.constant 0 : index
    %c0_10 = arith.constant 0 : index
    %47 = vector.load %arg5[%c0_9, %c0_10] : memref<8x72xf32, #tpu.memory_space<vmem>>, vector<8x72xf32>
    %c17_i32_11 = arith.constant 17 : i32
    %48 = tpu.dynamic_rotate %46 by %c17_i32_11 dim 1 : vector<8x256xf32>, i32 -> vector<8x256xf32>
    %49 = vector.extract_strided_slice %2 {offsets = [0, 0], sizes = [1, 256], strides = [1, 1]} : vector<9x256xf32> to vector<1x256xf32>
    %50 = vector.broadcast %49 : vector<1x256xf32> to vector<8x256xf32>
    %51 = arith.mulf %48, %50 : vector<8x256xf32>
    %c16_i32_12 = arith.constant 16 : i32
    %52 = tpu.dynamic_rotate %46 by %c16_i32_12 dim 1 : vector<8x256xf32>, i32 -> vector<8x256xf32>
    %53 = vector.extract_strided_slice %2 {offsets = [1, 0], sizes = [1, 256], strides = [1, 1]} : vector<9x256xf32> to vector<1x256xf32>
    %54 = vector.broadcast %53 : vector<1x256xf32> to vector<8x256xf32>
    %55 = arith.mulf %52, %54 : vector<8x256xf32>
    %c15_i32_13 = arith.constant 15 : i32
    %56 = tpu.dynamic_rotate %46 by %c15_i32_13 dim 1 : vector<8x256xf32>, i32 -> vector<8x256xf32>
    %57 = vector.extract_strided_slice %2 {offsets = [2, 0], sizes = [1, 256], strides = [1, 1]} : vector<9x256xf32> to vector<1x256xf32>
    %58 = vector.broadcast %57 : vector<1x256xf32> to vector<8x256xf32>
    %59 = arith.mulf %56, %58 : vector<8x256xf32>
    %c1_i32_14 = arith.constant 1 : i32
    %60 = tpu.dynamic_rotate %46 by %c1_i32_14 dim 1 : vector<8x256xf32>, i32 -> vector<8x256xf32>
    %61 = vector.extract_strided_slice %2 {offsets = [3, 0], sizes = [1, 256], strides = [1, 1]} : vector<9x256xf32> to vector<1x256xf32>
    %62 = vector.broadcast %61 : vector<1x256xf32> to vector<8x256xf32>
    %63 = arith.mulf %60, %62 : vector<8x256xf32>
    %c0_i32_15 = arith.constant 0 : i32
    %64 = tpu.dynamic_rotate %46 by %c0_i32_15 dim 1 : vector<8x256xf32>, i32 -> vector<8x256xf32>
    %65 = vector.extract_strided_slice %2 {offsets = [4, 0], sizes = [1, 256], strides = [1, 1]} : vector<9x256xf32> to vector<1x256xf32>
    %66 = vector.broadcast %65 : vector<1x256xf32> to vector<8x256xf32>
    %67 = arith.mulf %64, %66 : vector<8x256xf32>
    %c255_i32_16 = arith.constant 255 : i32
    %68 = tpu.dynamic_rotate %46 by %c255_i32_16 dim 1 : vector<8x256xf32>, i32 -> vector<8x256xf32>
    %69 = vector.extract_strided_slice %2 {offsets = [5, 0], sizes = [1, 256], strides = [1, 1]} : vector<9x256xf32> to vector<1x256xf32>
    %70 = vector.broadcast %69 : vector<1x256xf32> to vector<8x256xf32>
    %71 = arith.mulf %68, %70 : vector<8x256xf32>
    %c241_i32_17 = arith.constant 241 : i32
    %72 = tpu.dynamic_rotate %46 by %c241_i32_17 dim 1 : vector<8x256xf32>, i32 -> vector<8x256xf32>
    %73 = vector.extract_strided_slice %2 {offsets = [6, 0], sizes = [1, 256], strides = [1, 1]} : vector<9x256xf32> to vector<1x256xf32>
    %74 = vector.broadcast %73 : vector<1x256xf32> to vector<8x256xf32>
    %75 = arith.mulf %72, %74 : vector<8x256xf32>
    %c240_i32_18 = arith.constant 240 : i32
    %76 = tpu.dynamic_rotate %46 by %c240_i32_18 dim 1 : vector<8x256xf32>, i32 -> vector<8x256xf32>
    %77 = vector.extract_strided_slice %2 {offsets = [7, 0], sizes = [1, 256], strides = [1, 1]} : vector<9x256xf32> to vector<1x256xf32>
    %78 = vector.broadcast %77 : vector<1x256xf32> to vector<8x256xf32>
    %79 = arith.mulf %76, %78 : vector<8x256xf32>
    %c239_i32_19 = arith.constant 239 : i32
    %80 = tpu.dynamic_rotate %46 by %c239_i32_19 dim 1 : vector<8x256xf32>, i32 -> vector<8x256xf32>
    %81 = vector.extract_strided_slice %2 {offsets = [8, 0], sizes = [1, 256], strides = [1, 1]} : vector<9x256xf32> to vector<1x256xf32>
    %82 = vector.broadcast %81 : vector<1x256xf32> to vector<8x256xf32>
    %83 = arith.mulf %80, %82 : vector<8x256xf32>
    %84 = tpu.concatenate %51, %55, %59, %63, %67, %71, %75, %79, %83 in 0 : vector<8x256xf32>, vector<8x256xf32>, vector<8x256xf32>, vector<8x256xf32>, vector<8x256xf32>, vector<8x256xf32>, vector<8x256xf32>, vector<8x256xf32>, vector<8x256xf32> -> vector<72x256xf32>
    %cst_20 = arith.constant dense<0.000000e+00> : vector<8x256xf32>
    %85 = tpu.matmul %47, %84, %cst_20 {dimension_numbers = #tpu.dot_dimension_numbers<[1], [0], [0], [1], [0, 0, 1, 1], [], []>} : vector<8x72xf32>, vector<72x256xf32>, vector<8x256xf32> -> vector<8x256xf32>
    %c0_21 = arith.constant 0 : index
    %c0_22 = arith.constant 0 : index
    %86 = vector.load %arg6[%c0_21, %c0_22] : memref<8x1xf32, #tpu.memory_space<vmem>>, vector<8x1xf32>
    %87 = vector.broadcast %86 : vector<8x1xf32> to vector<8x256xf32>
    %88 = arith.addf %85, %87 : vector<8x256xf32>
    %89 = arith.addf %88, %1 : vector<8x256xf32>
    %cst_23 = arith.constant 0.000000e+00 : f32
    %90 = vector.broadcast %cst_23 : f32 to vector<8x256xf32>
    %91 = arith.maximumf %89, %90 : vector<8x256xf32>
    %c0_24 = arith.constant 0 : index
    %c0_25 = arith.constant 0 : index
    %c0_26 = arith.constant 0 : index
    %92 = vector.load %arg7[%c0_24, %c0_25, %c0_26] : memref<1x8x256xf32, #tpu.memory_space<vmem>>, vector<1x8x256xf32>
    %93 = vector.shape_cast %92 : vector<1x8x256xf32> to vector<8x256xf32>
    %94 = vector.shape_cast %91 : vector<8x256xf32> to vector<1x8x256xf32>
    tpu.vector_store %arg7[%c0_24, %c0_25, %c0_26], %94 {strides = array<i32>} : memref<1x8x256xf32, #tpu.memory_space<vmem>>, vector<1x8x256xf32>,
    return
  }
  func.func @transform_0(%arg0: i32) -> (i32, i32, i32) {
    %c0_i32 = arith.constant 0 : i32
    %c0_i32_0 = arith.constant 0 : i32
    %c0_i32_1 = arith.constant 0 : i32
    return %arg0, %c0_i32, %c0_i32_0 : i32, i32, i32
  }
  func.func @transform_1(%arg0: i32) -> (i32, i32) {
    %c0_i32 = arith.constant 0 : i32
    %c0_i32_0 = arith.constant 0 : i32
    %c0_i32_1 = arith.constant 0 : i32
    return %c0_i32, %c0_i32_0 : i32, i32
  }
  func.func @transform_2(%arg0: i32) -> (i32, i32) {
    %c0_i32 = arith.constant 0 : i32
    %c0_i32_0 = arith.constant 0 : i32
    %c0_i32_1 = arith.constant 0 : i32
    return %c0_i32, %c0_i32_0 : i32, i32
  }
  func.func @transform_3(%arg0: i32) -> (i32, i32) {
    %c0_i32 = arith.constant 0 : i32
    %c0_i32_0 = arith.constant 0 : i32
    %c0_i32_1 = arith.constant 0 : i32
    return %c0_i32, %c0_i32_0 : i32, i32
  }
  func.func @transform_4(%arg0: i32) -> (i32, i32) {
    %c0_i32 = arith.constant 0 : i32
    %c0_i32_0 = arith.constant 0 : i32
    %c0_i32_1 = arith.constant 0 : i32
    return %c0_i32, %c0_i32_0 : i32, i32
  }
  func.func @transform_5(%arg0: i32) -> (i32, i32) {
    %c0_i32 = arith.constant 0 : i32
    %c0_i32_0 = arith.constant 0 : i32
    %c0_i32_1 = arith.constant 0 : i32
    return %c0_i32, %c0_i32_0 : i32, i32
  }
  func.func @transform_6(%arg0: i32) -> (i32, i32, i32) {
    %c0_i32 = arith.constant 0 : i32
    %c0_i32_0 = arith.constant 0 : i32
    %c0_i32_1 = arith.constant 0 : i32
    return %arg0, %c0_i32, %c0_i32_0 : i32, i32, i32
  }
}

</mosaic_0001>

<bundles_post_ra>
// kernel: tpu_custom_call.1
= control target key start
LH: loop header
LB: loop body
LE: loop exit
PB: predicated region body
PF: predicated region fallthrough
CT: control target
= control target key end

     0   :  { %s1439_s0 = inlined_call_operand.hbm [shape: f32[2,8,256], index: 0, kind: input, shape index: {}]   ;;  %s1440_s1 = inlined_call_operand.hbm [shape: f32[9,256], index: 1, kind: input, shape index: {}]   ;;  %s1441_s2 = inlined_call_operand.vmem [shape: f32[8,72], index: 2, kind: input, shape index: {}]   ;;  %s1442_s3 = inlined_call_operand.vmem [shape: f32[8,1], index: 3, kind: input, shape index: {}]   ;;  %s1443_s4 = inlined_call_operand.vmem [shape: f32[8,72], index: 4, kind: input, shape index: {}]   ;;  %s1444_s5 = inlined_call_operand.vmem [shape: f32[8,1], index: 5, kind: input, shape index: {}]   ;;  %s1445_s6 = inlined_call_operand.hbm [shape: f32[2,8,256], index: 6, kind: output, shape index: {}]  }
   0x1   :  { %1450 = sst [smem:[#allocation11_spill]] %s1440_s1 }
   0x2   :  { %11 = vsyncpa [#allocation3], 0 }
   0x3   :  { %13 = vsyncpa [#allocation3 + $0x1], 0 }
   0x4   :  { %14 = vsyncpa [#allocation6], 0 }
   0x5   :  { %15 = vsyncpa [#allocation4], 0 }
   0x6   :  { %17 = vsyncpa [#allocation4 + $0x1], 0  ;;  %s1035_s21 = smov 0   ;;  %s1037_s22 = smov 0  }
   0x7   :  { %s1039_s23 = smov 0   ;;  %s1041_s24 = smov 0  }
   0x8 LB: > { %s1056_s25 = sadd.s32 4294967295, %s983_s24   ;;  %s769_s26 = sadd.s32 4294967294, %s983_s24   ;;  %s983_s24 = sphi %s1041_s24, %s1469_s24   ;;  %s979_s23 = sphi %s1039_s23, %s1468_s23   ;;  %s975_s22 = sphi %s1037_s22, %s1467_s22   ;;  %s971_s21 = sphi %s1035_s21, %s1466_s21  }
   0x9   : > { %p43_p0 = scmp.ne.s32.totalorder %s975_s22, %s971_s21  ;;  %p1446_p1 = scmp.eq.s32.totalorder %s1056_s25, 0 }
   0xa   : > { %p178_p3 = scmp.eq.s32.totalorder %s769_s26, 1  ;;  %p770_p5 = scmp.ge.s32.totalorder %s983_s24, 1 }
   0xb   : > { %p1065_p4 = por %p1446_p1, %p43_p0  ;;  %p185_p7 = scmp.lt.s32.totalorder %s983_s24, 3 }
   0xc   : > { %p1070_p6 = por %p178_p3, %p43_p0  ;;  %s985_s30 = smov [#allocation5]  }
   0xd   : > { %s1451_s27 = scalar_select %p1065_p4, 1, 0 }
   0xe   : > { %s1452_s28 = scalar_select %p1070_p6, 1, 0 }
   0xf   : > { %p1075_p8 = pnand %p770_p5, %p185_p7  ;;  %s197_s7 = sshll.u32 %s985_s30, 4  ;;  %s198_s7 = int_to_ptr.vmem [resolvable:$true] %s197_s7 }
  0x10   : > { %s1089_s9 = sadd.s32 1, %s983_s24   ;;  %s30_s10 = sadd.s32 1, %s979_s23 }
  0x11   : > { %s1453_s29 = scalar_select %p1075_p8, 1, 0 }
  0x12   : > { %p799_p9 = pneg %p1075_p8  ;;  %s27_s11 = ssub.s32 %s983_s24, %s1089_s9 }
  0x13   : > { %s872_s12 = scalar_lea.vmem %s198_s7, 512  ;;  %p880_p5 = scmp.lt.s32.totalorder %s198_s7, %s198_s7 }
  0x14   : > { %p1084_p11 = pnand %p799_p9, %p1446_p1  ;;  %p873_p13 = scmp.ne.s32.totalorder %s198_s7, %s872_s12 }
  0x15   : > { %p881_p7 = scmp.lt.s32.totalorder %s872_s12, %s872_s12 }
  0x16   : > { %p863_p12 = pneg %p1084_p11 }
  0x17   : > { %p882_p10 = por %p881_p7, %p880_p5 }
  0x18   : > { %p875_p0 = pnand %p873_p13, %p863_p12 }
  0x1a   : > { %p876_p3 = pneg %p875_p0 }
  0x1c   : > { %p883_p2 = pnand %p882_p10, %p876_p3 }
  0x1e   : > { %886 = shalt.err (!%p883_p2)
}
  0x1f   : > { %s986_s13 = smov 256   ;;  %s987_s14 = smov 16  }
  0x20   : > { %s1455_s1 = sld [smem:[#allocation11_spill]]  ;;  %p28_p9 = scmp.eq.s32.totalorder %s27_s11, 0 }
  0x21   : > { %p37_p12 = scmp.ne.s32.totalorder %s979_s23, %s975_s22  ;;  %p38_p10 = scmp.eq.s32.totalorder %s983_s24, 0 }
  0x22   : > { %p812_p2 = scmp.lt.s32.totalorder %s983_s24, 2  ;;  %p1456_p0 = scmp.eq.s32.totalorder %s1056_s25, 1 }
  0x23   : > { %s1106_s17 = scalar_select %p28_p9, %s979_s23, %s30_s10  }
  0x24   : > { %p39_p13 = por %p38_p10, %p37_p12  ;;  %p1110_p3 = por %p1456_p0, %p37_p12 }
  0x25   : > { %s223_s19 = sand.u32 1, %s979_s23   ;;  %s789_s20 = sshll.u32 %s983_s24, 8 }
  0x26   : > { %802 = dma.hbm_to_vmem [thread:$0]  (!%p1084_p11), %s1455_s1, 512, %s198_s7, [#allocation6], %s986_s13, %s986_s13, %s987_s14  }
  0x27   : > { %s1457_s18 = scalar_select %p1110_p3, 1, 0 }
  0x28   : > { %s773_s26 = sshll.u32 %s223_s19, 4  ;;  %s1119_s12 = scalar_lea.hbm %s1439_s0, %s789_s20 }
  0x29   : > { %s227_s7 = scalar_lea.vmem [#allocation2], %s773_s26  ;;  %p1121_p11 = pnand %p812_p2, %p39_p13 }
  0x2a   : > { %s235_s10 = sshll.u32 %s227_s7, 4  ;;  %s224_s13 = scalar_lea.sflag [#allocation3], %s223_s19  ;;  %s236_s10 = int_to_ptr.vmem [resolvable:$true] %s235_s10 }
  0x2b   : > { %s887_s14 = scalar_lea.hbm %s1119_s12, 256  ;;  %p889_p7 = pneg %p1121_p11 }
  0x2c   : > { %p888_p5 = scmp.ne.s32.totalorder %s1119_s12, %s887_s14  ;;  %s892_s20 = scalar_lea.hbm %s1439_s0, 512 }
  0x2d   : > { %p893_p10 = scmp.lt.s32.totalorder %s1119_s12, %s1439_s0  ;;  %p894_p2 = scmp.lt.s32.totalorder %s892_s20, %s887_s14 }
  0x2e   : > { %p890_p9 = pnand %p889_p7, %p888_p5 }
  0x2f   : > { %p895_p13 = por %p894_p2, %p893_p10 }
  0x30   : > { %p891_p12 = pneg %p890_p9 }
  0x32   : > { %p896_p0 = pnand %p895_p13, %p891_p12 }
  0x34   : > { %899 = shalt.err (!%p896_p0)
}
  0x35   : > { %s900_s8 = scalar_lea.vmem %s236_s10, 256  ;;  %s988_s19 = smov [#allocation2]  }
  0x36   : > { %p901_p1 = scmp.ne.s32.totalorder %s236_s10, %s900_s8  ;;  %s905_s7 = sshll.u32 %s988_s19, 4  ;;  %s906_s7 = int_to_ptr.vmem [resolvable:$false] %s905_s7 }
  0x37   : > { %s907_s1 = scalar_lea.vmem %s906_s7, 512  ;;  %p908_p5 = scmp.lt.s32.totalorder %s236_s10, %s906_s7 }
  0x38   : > { %p903_p6 = pnand %p901_p1, %p889_p7  ;;  %p909_p9 = scmp.lt.s32.totalorder %s907_s1, %s900_s8 }
  0x3a   : > { %p904_p3 = pneg %p903_p6  ;;  %p910_p4 = por %p909_p9, %p908_p5 }
  0x3c   : > { %p911_p8 = pnand %p910_p4, %p904_p3 }
  0x3e   : > { %914 = shalt.err (!%p911_p8)
}
  0x3f   : > { %806 = dma.hbm_to_vmem [thread:$0]  (!%p1121_p11), %s1119_s12, 256, %s236_s10, %s224_s13  }
  0x40   : > { %p1459_p12 = scmp.ne.s32.totalorder %s1453_s29, 0 }
  0x41   : > { %s1142_s14 = sand.u32 (!%p1459_p12), 1, %s975_s22   ;;  %p1460_p1 = scmp.ne.s32.totalorder (!%p1459_p12), %s1451_s27, 0 }
  0x42   : > { %244 = sbr.rel (%p1459_p12) target bundleno = 787 (0x313), region = 44  ;;  %s777_s15 = sshll.u32 (!%p1459_p12), %s1142_s14, 4 }
  0x43   : > { %s247_s16 = scalar_lea.sflag (!%p1459_p12), [#allocation3], %s1142_s14  ;;  %s250_s1 = scalar_lea.vmem (!%p1459_p12), [#allocation2], %s777_s15 }
  0x47   : > { %958 = dma.done.wait (%p1460_p1), %s247_s16, 256  }
  0x48   : > { %960 = vsyncadd (%p1460_p1), %s247_s16, 4294967040  ;;  %p1461_p4 = scmp.eq.s32.totalorder %s1056_s25, 0 }
  0x4a   : > { %962 = dma.done.wait (%p1461_p4), [#allocation6], 512   ;;  %p1462_p6 = pmov %p1461_p4 }
  0x4b   : > { %v1156_v0 = vld [vmem:[%s250_s1] sm:$0xff]  ;;  %s989_s29 = smov 112   ;;  %s990_s12 = smov 111   ;;  %v1162_v1 = vld [vmem:[%s250_s1 + $0x8] sm:$0xff]  ;;  %v994_v2 = vmov 0.0   ;;  %v996_v3 = vmov 0   ;;  %v294_v5 = vlaneseq }
  0x4c   : > { %964 = vsyncadd (%p1462_p6), [#allocation6], 4294966784  ;;  %404 = vrot.lane.b32.xlu1 %v1156_v0, %s989_s29  ;;  %421 = vrot.lane.b32.xlu0 %v1156_v0, %s990_s12  ;;  %s991_s27 = smov 113   ;;  %s992_s10 = smov 127   ;;  %v438_v4 = vld [vmem:[%s1442_s3] sm:$0xff]  ;;  %v1202_v12 = vld [vmem:[#allocation5 + $0x8] sm:$0xff] }
  0x4d   : > { %s993_s11 = smov 1   ;;  %512 = vmatprep.mubr.f32.mxu0 %v994_v2  ;;  %661 = vmatprep.mubr.f32.mxu1 %v994_v2  ;;  %s995_s13 = smov 15   ;;  %v1195_v6 = vshrl.u32 %v294_v5, 7  ;;  %v1197_v7 = vand.u32 127, %v294_v5  ;;  %v1200_v11 = vld [vmem:[#allocation5] sm:$0xff]  ;;  %vm444_vm8 = vcmask 588800  }
  0x4e   : > { %860 = vset.pattern.permute.xlu0 %v996_v3  ;;  %s997_s20 = smov 16   ;;  %s998_s30 = smov 17   ;;  %v1207_v14 = vld [vmem:[#allocation5 + $0x18] ss:$0 sm:$0xff]  ;;  %v1210_v15 = vld [vmem:[#allocation5 + $0x10] ss:$0 sm:$0xff] }
  0x4f   : > { %v413_v10 = vsub.s32 7, %v1195_v6  ;;  %v396_v13 = vsub.s32 6, %v1195_v6  ;;  %vm408_vm0 = vcmp.lt.s32.totalorder %v1197_v7, 112  ;;  %vm425_vm1 = vcmp.lt.s32.totalorder %v1197_v7, 111  ;;  %s675_s26 = scalar_lea.sflag [#allocation4], %s1142_s14  ;;  %p1463_p3 = scmp.ne.s32.totalorder %s1457_s18, 0 }
  0x50   : > { %406 = vrot.lane.b32.xlu1 %v1162_v1, %s989_s29  ;;  %423 = vrot.lane.b32.xlu0 %v1162_v1, %s990_s12  ;;  %vm391_vm2 = vcmp.lt.s32.totalorder %v1197_v7, 113  ;;  %v379_v20 = vsub.s32 5, %v1195_v6  ;;  %v362_v21 = vsub.s32 4, %v1195_v6  ;;  %vm374_vm3 = vcmp.lt.s32.totalorder %v1197_v7, 127 }
  0x51   : > { %v1213_v16 = vrot.slane %v1200_v11, %v413_v10  ;;  %v1216_v17 = vrot.slane %v1202_v12, %v413_v10  ;;  %v1227_v25 = vrot.slane %v1200_v11, %v396_v13  ;;  %v1233_v28 = vrot.slane %v1202_v12, %v396_v13 }
  0x52   : > { %v1239_v33 = vrot.slane %v1200_v11, %v379_v20  ;;  %v352_v37 = vsub.s32 3, %v1195_v6  ;;  %v1250_v40 = vrot.slane %v1202_v12, %v379_v20  ;;  %v1253_v41 = vrot.slane %v1202_v12, %v362_v21 }
  0x53   : > { %v1256_v42 = vrot.slane %v1200_v11, %v362_v21  ;;  %vm347_vm4 = vcmp.lt.s32.totalorder %v1197_v7, 1  ;;  %v335_v52 = vsub.s32 2, %v1195_v6  ;;  %vm330_vm5 = vcmp.lt.s32.totalorder %v1197_v7, 15 }
  0x54   : > { %389 = vrot.lane.b32.xlu1 %v1162_v1, %s991_s27  ;;  %387 = vrot.lane.b32.xlu0 %v1156_v0, %s991_s27  ;;  %v1264_v47 = vrot.slane %v1200_v11, %v352_v37  ;;  %v1267_v48 = vrot.slane %v1202_v12, %v352_v37  ;;  %v369_v51 = vmul.f32 %v1253_v41, %v1162_v1  ;;  %v318_v58 = vsub.s32 1, %v1195_v6 }
  0x55   : > { %v368_v53 = vmul.f32 %v1256_v42, %v1156_v0  ;;  %v1285_v61 = vrot.slane %v1200_v11, %v335_v52  ;;  %v1288_v62 = vrot.slane %v1202_v12, %v335_v52  ;;  %vm313_vm6 = vcmp.lt.s32.totalorder %v1197_v7, 16 }
  0x56   : > { %v1296_v5 = vrot.slane %v1200_v11, %v318_v58  ;;  %v1301_v10 = vrot.slane %v1202_v12, %v318_v58  ;;  %v301_v13 = vsub.s32 0, %v1195_v6  ;;  %vm296_vm7 = vcmp.lt.s32.totalorder %v1197_v7, 17 }
  0x58   : > { %372 = vrot.lane.b32.xlu1 %v1162_v1, %s992_s10  ;;  %370 = vrot.lane.b32.xlu0 %v1156_v0, %s992_s10  ;;  %v1315_v6 = vrot.slane %v1202_v12, %v301_v13 }
  0x5c   : > { %345 = vrot.lane.b32.xlu1 %v1162_v1, %s993_s11  ;;  %343 = vrot.lane.b32.xlu0 %v1156_v0, %s993_s11 }
  0x60   : > { %328 = vrot.lane.b32.xlu1 %v1162_v1, %s995_s13  ;;  %326 = vrot.lane.b32.xlu0 %v1156_v0, %s995_s13 }
  0x64   : > { %311 = vrot.lane.b32.xlu1 %v1162_v1, %s997_s20  ;;  %309 = vrot.lane.b32.xlu0 %v1156_v0, %s997_s20 }
  0x68   : > { %292 = vrot.lane.b32.xlu1 %v1162_v1, %s998_s30  ;;  %290 = vrot.lane.b32.xlu0 %v1156_v0, %s998_s30 }
  0x6c   : > { %441 = vperm.xlu0 %860, %v438_v4  }
  0xbe   : > { %v405_v8 = vpop.permute.xlu1 %404  ;;  %v422_v9 = vpop.permute.xlu0 %421 }
  0xc2   : > { %v407_v18 = vpop.permute.xlu1 %406  ;;  %v424_v19 = vpop.permute.xlu0 %423 }
  0xc3   : > { %v410_v22 = vsel %vm408_vm0, %v407_v18, %v405_v8  ;;  %v426_v23 = vsel %vm425_vm1, %v422_v9, %v424_v19  ;;  %v427_v24 = vsel %vm425_vm1, %v424_v19, %v422_v9  ;;  %v409_v26 = vsel %vm408_vm0, %v405_v8, %v407_v18 }
  0xc4   : > { %v437_v27 = vmul.f32 %v1207_v14, %v427_v24  ;;  %v436_v29 = vmul.f32 %v1210_v15, %v426_v23  ;;  %v420_v30 = vmul.f32 %v1216_v17, %v410_v22  ;;  %v419_v34 = vmul.f32 %v1213_v16, %v409_v26 }
  0xc5   : > { %v1312_v24 = vrot.slane %v1200_v11, %v301_v13  ;;  %v289_v11 = vld [vmem:[%s1441_s2] sm:$0xff] }
  0xc6   : > { %v390_v31 = vpop.permute.xlu1 %389  ;;  %462 = vmatprep.subr.mxu0 %v437_v27  ;;  %v388_v32 = vpop.permute.xlu0 %387 }
  0xc7   : > { %v392_v35 = vsel %vm391_vm2, %v388_v32, %v390_v31  ;;  %v393_v36 = vsel %vm391_vm2, %v390_v31, %v388_v32  ;;  %463 = vmatpush1.msra.mxu0 %v436_v29 }
  0xc8   : > { %v402_v38 = vmul.f32 %v1227_v25, %v392_v35  ;;  %v403_v39 = vmul.f32 %v1233_v28, %v393_v36  ;;  %464 = vmatprep.subr.mxu0 %v420_v30 }
  0xc9   : > { %465 = vmatpush1.msra.mxu0 %v419_v34 }
  0xca   : > { %v373_v43 = vpop.permute.xlu1 %372  ;;  %466 = vmatprep.subr.mxu0 %v403_v39  ;;  %v371_v44 = vpop.permute.xlu0 %370 }
  0xcb   : > { %v375_v45 = vsel %vm374_vm3, %v371_v44, %v373_v43  ;;  %v376_v46 = vsel %vm374_vm3, %v373_v43, %v371_v44  ;;  %467 = vmatpush1.msra.mxu0 %v402_v38  ;;  %v588_v43 = vld [vmem:[%s1444_s5] sm:$0xff] }
  0xcc   : > { %v385_v49 = vmul.f32 %v1239_v33, %v375_v45  ;;  %v386_v50 = vmul.f32 %v1250_v40, %v376_v46 }
  0xce   : > { %v346_v54 = vpop.permute.xlu1 %345  ;;  %468 = vmatprep.subr.mxu0 %v386_v50  ;;  %v344_v55 = vpop.permute.xlu0 %343 }
  0xcf   : > { %v348_v56 = vsel %vm347_vm4, %v344_v55, %v346_v54  ;;  %v349_v57 = vsel %vm347_vm4, %v346_v54, %v344_v55  ;;  %469 = vmatpush1.msra.mxu0 %v385_v49 }
  0xd0   : > { %v358_v59 = vmul.f32 %v1264_v47, %v349_v57  ;;  %v359_v60 = vmul.f32 %v1267_v48, %v348_v56  ;;  %470 = vmatprep.subr.mxu0 %v369_v51 }
  0xd1   : > { %471 = vmatpush1.msra.mxu0 %v368_v53 }
  0xd2   : > { %v329_v63 = vpop.permute.xlu1 %328  ;;  %v327_v2 = vpop.permute.xlu0 %326  ;;  %472 = vmatprep.subr.mxu0 %v359_v60 }
  0xd3   : > { %v331_v3 = vsel %vm330_vm5, %v327_v2, %v329_v63  ;;  %v332_v4 = vsel %vm330_vm5, %v329_v63, %v327_v2  ;;  %473 = vmatpush1.msra.mxu0 %v358_v59 }
  0xd4   : > { %v341_v8 = vmul.f32 %v1285_v61, %v332_v4  ;;  %v342_v9 = vmul.f32 %v1288_v62, %v331_v3 }
  0xd6   : > { %v312_v18 = vpop.permute.xlu1 %311  ;;  %v310_v19 = vpop.permute.xlu0 %309  ;;  %474 = vmatprep.subr.mxu0 %v342_v9 }
  0xd7   : > { %v314_v20 = vsel %vm313_vm6, %v310_v19, %v312_v18  ;;  %v315_v21 = vsel %vm313_vm6, %v312_v18, %v310_v19  ;;  %475 = vmatpush1.msra.mxu0 %v341_v8 }
  0xd8   : > { %v324_v22 = vmul.f32 %v1296_v5, %v315_v21  ;;  %v325_v23 = vmul.f32 %v1301_v10, %v314_v20 }
  0xda   : > { %v293_v26 = vpop.permute.xlu1 %292  ;;  %v291_v27 = vpop.permute.xlu0 %290  ;;  %476 = vmatprep.subr.mxu0 %v325_v23 }
  0xdb   : > { %v297_v29 = vsel %vm296_vm7, %v291_v27, %v293_v26  ;;  %v298_v30 = vsel %vm296_vm7, %v293_v26, %v291_v27  ;;  %477 = vmatpush1.msra.mxu0 %v324_v22 }
  0xdc   : > { %v307_v31 = vmul.f32 %v1312_v24, %v298_v30  ;;  %v308_v32 = vmul.f32 %v1315_v6, %v297_v29 }
  0xde   : > { %478 = vmatprep.subr.mxu0 %v308_v32 }
  0xdf   : > { %479 = vmatpush1.msra.mxu0 %v307_v31 }
  0xe0   : > { %782 = vmatmul.mubr.msk.f32.vlgmr.msra.gmra.mxu0 %vm444_vm8, %v289_v11 }
  0xe7   : > { %v442_v12 = vpop.permute.xlu0 %441 }
 0x1a0   : > { %v514_v34 = vpop.f32.mrf.mxu0 }
 0x1a1   : > { %v515_v35 = vadd.f32 %v514_v34, %v442_v12 }
 0x1a2   : > { %v516_v36 = vpop.f32.mrf.mxu0 }
 0x1a3   : > { %v519_v37 = vmax.f32 %v515_v35, 0.0  ;;  %v517_v38 = vadd.f32 %v516_v36, %v442_v12 }
 0x1a5   : > { %572 = vrot.lane.b32.xlu0 %v519_v37, %s989_s29  ;;  %580 = vrot.lane.b32.xlu1 %v519_v37, %s990_s12  ;;  %v520_v39 = vmax.f32 %v517_v38, 0.0  ;;  %v554_v20 = vmul.f32 %v519_v37, %v1256_v42 }
 0x1a9   : > { %564 = vrot.lane.b32.xlu0 %v519_v37, %s991_s27  ;;  %582 = vrot.lane.b32.xlu1 %v520_v39, %s990_s12 }
 0x1ad   : > { %556 = vrot.lane.b32.xlu0 %v519_v37, %s992_s10  ;;  %574 = vrot.lane.b32.xlu1 %v520_v39, %s989_s29 }
 0x1b1   : > { %546 = vrot.lane.b32.xlu0 %v519_v37, %s993_s11  ;;  %566 = vrot.lane.b32.xlu1 %v520_v39, %s991_s27  ;;  %s790_s27 = sshll.u32 %s1056_s25, 8  ;;  %s999_s25 = smov [#allocation7]  }
 0x1b5   : > { %538 = vrot.lane.b32.xlu0 %v519_v37, %s995_s13  ;;  %558 = vrot.lane.b32.xlu1 %v520_v39, %s992_s10  ;;  %s282_s10 = scalar_lea.vmem [#allocation7], %s777_s15  ;;  %s919_s15 = sshll.u32 %s999_s25, 4  ;;  %s920_s15 = int_to_ptr.vmem [resolvable:$false] %s919_s15 }
 0x1b6   : > { %s921_s19 = scalar_lea.vmem %s920_s15, 512 }
 0x1b9   : > { %530 = vrot.lane.b32.xlu0 %v519_v37, %s997_s20  ;;  %548 = vrot.lane.b32.xlu1 %v520_v39, %s993_s11  ;;  %s689_s11 = sshll.u32 %s282_s10, 4  ;;  %s690_s11 = int_to_ptr.vmem [resolvable:$true] %s689_s11 }
 0x1ba   : > { %s915_s8 = scalar_lea.vmem %s690_s11, 256  ;;  %p922_p10 = scmp.lt.s32.totalorder %s690_s11, %s920_s15 }
 0x1bb   : > { %p916_p8 = scmp.ne.s32.totalorder %s690_s11, %s915_s8  ;;  %p923_p2 = scmp.lt.s32.totalorder %s921_s19, %s915_s8 }
 0x1bd   : > { %522 = vrot.lane.b32.xlu0 %v519_v37, %s998_s30  ;;  %540 = vrot.lane.b32.xlu1 %v520_v39, %s995_s13  ;;  %p917_p11 = pnand %p916_p8, %p1463_p3  ;;  %p924_p13 = por %p923_p2, %p922_p10 }
 0x1bf   : > { %p918_p7 = pneg %p917_p11 }
 0x1c1   : > { %591 = vperm.xlu0 %860, %v588_v43   ;;  %532 = vrot.lane.b32.xlu1 %v520_v39, %s997_s20  ;;  %p925_p0 = pnand %p924_p13, %p918_p7 }
 0x1c5   : > { %524 = vrot.lane.b32.xlu1 %v520_v39, %s998_s30  ;;  %s687_s30 = scalar_lea.hbm %s1445_s6, %s790_s27 }
 0x217   : > { %v573_v44 = vpop.permute.xlu0 %572  ;;  %v581_v45 = vpop.permute.xlu1 %580 }
 0x21b   : > { %v565_v46 = vpop.permute.xlu0 %564  ;;  %v583_v49 = vpop.permute.xlu1 %582 }
 0x21c   : > { %v584_v50 = vsel %vm425_vm1, %v581_v45, %v583_v49  ;;  %v585_v51 = vsel %vm425_vm1, %v583_v49, %v581_v45 }
 0x21d   : > { %v587_v52 = vmul.f32 %v1207_v14, %v585_v51  ;;  %v586_v53 = vmul.f32 %v1210_v15, %v584_v50 }
 0x21f   : > { %v557_v54 = vpop.permute.xlu0 %556  ;;  %611 = vmatprep.subr.mxu1 %v587_v52  ;;  %v575_v55 = vpop.permute.xlu1 %574 }
 0x220   : > { %v576_v56 = vsel %vm408_vm0, %v573_v44, %v575_v55  ;;  %v577_v57 = vsel %vm408_vm0, %v575_v55, %v573_v44  ;;  %612 = vmatpush1.msra.mxu1 %v586_v53 }
 0x221   : > { %v578_v58 = vmul.f32 %v576_v56, %v1213_v16  ;;  %v579_v59 = vmul.f32 %v577_v57, %v1216_v17 }
 0x223   : > { %613 = vmatprep.subr.mxu1 %v579_v59  ;;  %v567_v60 = vpop.permute.xlu1 %566  ;;  %v547_v63 = vpop.permute.xlu0 %546 }
 0x224   : > { %v568_v14 = vsel %vm391_vm2, %v565_v46, %v567_v60  ;;  %v569_v15 = vsel %vm391_vm2, %v567_v60, %v565_v46  ;;  %614 = vmatpush1.msra.mxu1 %v578_v58 }
 0x225   : > { %v570_v2 = vmul.f32 %v568_v14, %v1227_v25  ;;  %v571_v3 = vmul.f32 %v569_v15, %v1233_v28  ;;  %v555_v25 = vmul.f32 %v520_v39, %v1253_v41 }
 0x227   : > { %615 = vmatprep.subr.mxu1 %v571_v3  ;;  %v559_v4 = vpop.permute.xlu1 %558  ;;  %v539_v13 = vpop.permute.xlu0 %538 }
 0x228   : > { %v560_v16 = vsel %vm374_vm3, %v557_v54, %v559_v4  ;;  %v561_v17 = vsel %vm374_vm3, %v559_v4, %v557_v54  ;;  %616 = vmatpush1.msra.mxu1 %v570_v2 }
 0x229   : > { %v562_v8 = vmul.f32 %v560_v16, %v1239_v33  ;;  %v563_v9 = vmul.f32 %v561_v17, %v1250_v40 }
 0x22b   : > { %617 = vmatprep.subr.mxu1 %v563_v9  ;;  %v549_v18 = vpop.permute.xlu1 %548  ;;  %v531_v23 = vpop.permute.xlu0 %530 }
 0x22c   : > { %v550_v28 = vsel %vm347_vm4, %v547_v63, %v549_v18  ;;  %v551_v19 = vsel %vm347_vm4, %v549_v18, %v547_v63  ;;  %618 = vmatpush1.msra.mxu1 %v562_v8 }
 0x22d   : > { %v552_v21 = vmul.f32 %v551_v19, %v1264_v47  ;;  %v553_v33 = vmul.f32 %v550_v28, %v1267_v48  ;;  %619 = vmatprep.subr.mxu1 %v555_v25 }
 0x22e   : > { %620 = vmatpush1.msra.mxu1 %v554_v20 }
 0x22f   : > { %v541_v40 = vpop.permute.xlu1 %540  ;;  %621 = vmatprep.subr.mxu1 %v553_v33  ;;  %v523_v31 = vpop.permute.xlu0 %522 }
 0x230   : > { %v542_v41 = vsel %vm330_vm5, %v539_v13, %v541_v40  ;;  %v543_v22 = vsel %vm330_vm5, %v541_v40, %v539_v13  ;;  %622 = vmatpush1.msra.mxu1 %v552_v21 }
 0x231   : > { %v544_v26 = vmul.f32 %v543_v22, %v1285_v61  ;;  %v545_v42 = vmul.f32 %v542_v41, %v1288_v62 }
 0x233   : > { %v533_v27 = vpop.permute.xlu1 %532  ;;  %623 = vmatprep.subr.mxu1 %v545_v42 }
 0x234   : > { %v534_v47 = vsel %vm313_vm6, %v531_v23, %v533_v27  ;;  %v535_v48 = vsel %vm313_vm6, %v533_v27, %v531_v23  ;;  %624 = vmatpush1.msra.mxu1 %v544_v26 }
 0x235   : > { %v536_v29 = vmul.f32 %v535_v48, %v1296_v5  ;;  %v537_v30 = vmul.f32 %v534_v47, %v1301_v10  ;;  %v521_v5 = vld [vmem:[%s1443_s4] sm:$0xff] }
 0x237   : > { %v525_v32 = vpop.permute.xlu1 %524  ;;  %625 = vmatprep.subr.mxu1 %v537_v30 }
 0x238   : > { %v526_v61 = vsel %vm296_vm7, %v523_v31, %v525_v32  ;;  %v527_v62 = vsel %vm296_vm7, %v525_v32, %v523_v31  ;;  %626 = vmatpush1.msra.mxu1 %v536_v29 }
 0x239   : > { %v528_v11 = vmul.f32 %v527_v62, %v1312_v24  ;;  %v529_v12 = vmul.f32 %v526_v61, %v1315_v6 }
 0x23b   : > { %627 = vmatprep.subr.mxu1 %v529_v12 }
 0x23c   : > { %628 = vmatpush1.msra.mxu1 %v528_v11  ;;  %v592_v10 = vpop.permute.xlu0 %591 }
 0x23d   : > { %783 = vmatmul.mubr.msk.f32.vlgmr.msra.gmra.mxu1 %vm444_vm8, %v521_v5 }
 0x2fd   : > { %v663_v34 = vpop.f32.mrf.mxu1 }
 0x2fe   : > { %v664_v35 = vadd.f32 %v663_v34, %v592_v10 }
 0x2ff   : > { %v665_v7 = vpop.f32.mrf.mxu1 }
 0x300   : > { %v668_v36 = vadd.f32 %v664_v35, %v1156_v0  ;;  %v666_v37 = vadd.f32 %v665_v7, %v592_v10 }
 0x302   : > { %v670_v24 = vmax.f32 %v668_v36, 0.0  ;;  %v669_v6 = vadd.f32 %v666_v37, %v1162_v1 }
 0x304   : > { %672 = vst [vmem:[%s282_s10] sm:$0xff] %v670_v24  ;;  %v671_v38 = vmax.f32 %v669_v6, 0.0 }
 0x306   : > { %673 = vst [vmem:[%s282_s10 + $0x8] sm:$0xff] %v671_v38 }
 0x307   : > { %928 = shalt.err (!%p925_p0)
}
 0x308   : > { %s929_s7 = scalar_lea.hbm %s687_s30, 256  ;;  %s933_s1 = scalar_lea.hbm %s1445_s6, 512 }
 0x309   : > { %p930_p5 = scmp.ne.s32.totalorder %s687_s30, %s929_s7  ;;  %p934_p1 = scmp.lt.s32.totalorder %s687_s30, %s1445_s6 }
 0x30a   : > { %p935_p4 = scmp.lt.s32.totalorder %s933_s1, %s929_s7 }
 0x30b   : > { %p931_p9 = pnand %p930_p5, %p1463_p3 }
 0x30c   : > { %p936_p6 = por %p935_p4, %p934_p1 }
 0x30d   : > { %p932_p12 = pneg %p931_p9 }
 0x30f   : > { %p937_p8 = pnand %p936_p6, %p932_p12 }
 0x311   : > { %940 = shalt.err (!%p937_p8)
}
 0x312   : > { %797 = dma.vmem_to_hbm [thread:$0]  (%p1463_p3), %s690_s11, 256, %s687_s30, %s675_s26  }
 0x313 PF: > { %s701_s27 = sand.u32 1, %s971_s21   ;;  %p1464_p11 = scmp.ne.s32.totalorder %s1452_s28, 0 }
 0x314   : > { %p1465_p7 = scmp.ge.s32.totalorder %s983_s24, 2  ;;  %s702_s10 = scalar_lea.sflag [#allocation4], %s701_s27 }
 0x316   : > { %p808_p10 = pnand %p1465_p7, %p1464_p11 }
 0x318   : > { %p809_p2 = pneg %p808_p10 }
 0x31a   : > { %966 = dma.done.wait (%p809_p2), %s702_s10, 256  }
 0x31b   : > { %968 = vsyncadd (%p809_p2), %s702_s10, 4294967040  ;;  %p20_p13 = scmp.ge.s32.totalorder %s1089_s9, 4   ;;  %s1466_s21 = smov %s975_s22 }
 0x31c   : > { %s1467_s22 = smov %s979_s23  ;;  %s1468_s23 = smov %s1106_s17 }
 0x31d   : > { %s1469_s24 = smov %s1089_s9  ;;  %22 = sbr.rel (!%p20_p13) target bundleno = 8 (0x8), region = 93 }
 0x322   :  { %707 = vsyncpa [#allocation3], 1 }
 0x323   :  { %709 = vsyncpa [#allocation3 + $0x1], 1 }
 0x324   :  { %710 = vsyncpa [#allocation6], 1 }
 0x325   :  { %711 = vsyncpa [#allocation4], 1 }
 0x326   :  { %713 = vsyncpa [#allocation4 + $0x1], 1 }

</bundles_post_ra>
